<compile_context>
chip_gen: v6e
topology: v6e:2x2x1
jax: 0.10.0
libtpu: 0.0.40
codegen_flags: <defaults>
</compile_context>

<pallas_src>
from functools import partial

import numpy as np
import jax
import jax.numpy as jnp
from jax.experimental import pallas as pl
from jax.experimental.pallas import tpu as pltpu


def _readout_kernel(e_ref, w1_ref, b_ref, w2_ref, o_ref, *, anchor):
    # Per grid step (= TB queries):
    #   e_ref  : (TB, N, D) f32  raw embeddings (no gather, no pad, no pre-cast)
    #   w1_ref : (2D, Dp)  bf16  full Linear1 weight (transposed layout), lanes padded
    #   b_ref  : (2, Dp)   f32   row 0 = b1, row 1 = (N-1)*b2 (constant pre-folded)
    #   w2_ref : (Dp, Dp)  f32   Linear2 weight (kept f32: no rounding of the sum)
    #   o_ref  : (TB, Dp)  f32   per-query scatter-added readout (full-tile store)
    TB, N, D = e_ref.shape
    Dp = o_ref.shape[-1]

    e32 = e_ref[...]                                          # (TB, N, D) f32 block
    # f32->bf16 cast on the VPU in VMEM (saves a wrapper-side HBM pass).
    e = e32.reshape(TB * N, D).astype(w1_ref.dtype)           # layout-preserving merge
    t = e32[:, anchor, :].astype(w1_ref.dtype)                # (TB, D) target rows

    w1t = w1_ref[0:D, :]                                      # target half of Linear1
    w1n = w1_ref[D:2 * D, :]                                  # non-target half
    b1 = b_ref[0:1, :]                                        # (1, Dp) f32
    b2s = b_ref[1:2, :]                                       # (1, Dp) f32 == (N-1)*b2

    # One big MXU matmul over all TB*N rows (anchor rows included; removed below).
    n_proj = jnp.dot(e, w1n, preferred_element_type=jnp.float32)         # (TB*N, Dp)
    n_proj = n_proj.reshape(TB, N, Dp)
    # Target-half projection: once per query, broadcast to its N rows
    # (instead of replicating the target (N-1)x through the MXU).
    t_proj = jnp.dot(t, w1t, preferred_element_type=jnp.float32)         # (TB, Dp)

    h = jnp.maximum(n_proj + t_proj[:, None, :] + b1, 0.0)               # (TB, N, Dp) f32

    # scatter_add over each query's contiguous non-target block
    #   == sum over all N rows  minus  the anchor's own (spurious) row.
    # Subtracting h[:, anchor, :] cancels it exactly (same computed values).
    h_sum = jnp.sum(h, axis=1) - h[:, anchor, :]                         # (TB, Dp) f32

    # Tiny second Linear, hoisted after the segment sum; kept in f32.
    y = jnp.dot(h_sum, w2_ref[...], preferred_element_type=jnp.float32)  # (TB, Dp)
    o_ref[...] = y + b2s


def target_mlp_readout(embs, batch_idx, batch_size, num_nodes, num_anchors,
                       w1, b1, w2, b2, num_segments=None,
                       compute_dtype=jnp.bfloat16, query_tile=64):
    """Pallas equivalent of the mpqe MLP readout (Linear->ReLU->Linear->scatter_add).

    Contract (matches the module's own collate): ``batch_idx == repeat(arange(B), N)``
    and the single target node sits at index ``num_anchors`` inside every query's
    contiguous block of ``num_nodes`` embedding rows.  The contract is checked when
    ``batch_idx`` is concrete; under tracing it is assumed.
    """
    dim = embs.shape[-1]
    n_eff = num_nodes - 1                      # non-target rows per query
    if num_segments is None:
        num_segments = int(batch_size)
    assert num_segments == batch_size, "fast path: one contiguous segment per query"
    assert 0 <= num_anchors < num_nodes
    # TODO(synk): general/ragged batch_idx or scatter_mean/scatter_max would need a
    # masked epilogue; this kernel fixes scatter_fn = scatter_add over the contiguous
    # equal-length segments produced by the module's own collate.
    bi = None
    try:
        bi = np.asarray(batch_idx).reshape(-1)             # only possible when concrete
    except Exception:
        pass
    if bi is not None:
        expected = np.repeat(np.arange(batch_size), num_nodes)
        assert np.array_equal(bi, expected), \
            "fast path needs batch_idx == repeat(arange(batch_size), num_nodes)"

    Dp = pl.cdiv(dim, 128) * 128               # lane-dense padded feature width

    # ---- tiny broadcast params: pad/cast once (re-used by every grid step) ----
    w1_p = jnp.pad(w1, ((0, 0), (0, Dp - dim))).astype(compute_dtype)        # (2D, Dp)
    w2_p = jnp.pad(w2, ((0, Dp - dim), (0, Dp - dim))).astype(jnp.float32)   # (Dp, Dp)
    b_p = jnp.stack([jnp.pad(b1, (0, Dp - dim)),
                     jnp.pad(n_eff * b2, (0, Dp - dim))]).astype(jnp.float32)  # (2, Dp)

    # ---- embeddings: raw f32 stream, no gather / no pad / no cast in HBM ----
    e3 = embs.reshape(batch_size, num_nodes, dim)           # free (contiguous) reshape

    TB = min(int(query_tile), int(batch_size))              # queries per grid step
    if TB >= 8:
        TB -= TB % 8                                        # full-sublane output tiles
    Bp = -(-batch_size // TB) * TB
    if Bp != batch_size:
        # Ragged-batch fallback only: pad whole dummy queries (sliced off below).
        e3 = jnp.pad(e3, ((0, Bp - batch_size), (0, 0), (0, 0)))

    kernel = partial(_readout_kernel, anchor=int(num_anchors))

    out = pl.pallas_call(
        kernel,
        out_shape=jax.ShapeDtypeStruct((Bp, Dp), jnp.float32),
        grid=(Bp // TB,),
        in_specs=[
            pl.BlockSpec((TB, num_nodes, dim), lambda i: (i, 0, 0)),  # raw f32 embeddings
            pl.BlockSpec((2 * dim, Dp), lambda i: (0, 0)),            # W1 (both halves)
            pl.BlockSpec((2, Dp), lambda i: (0, 0)),                  # [b1 ; (N-1)*b2]
            pl.BlockSpec((Dp, Dp), lambda i: (0, 0)),                 # W2 (f32)
        ],
        out_specs=pl.BlockSpec((TB, Dp), lambda i: (i, 0)),
        compiler_params=pltpu.CompilerParams(
            dimension_semantics=("parallel",),      # megacore / v7x 2-TC sharding
            # VMEM is not the TB constraint here (per-step buffers are <1 MiB);
            # 32 MiB is comfortably below every generation's physical VMEM.
            vmem_limit_bytes=32 * 1024 * 1024),
    )(e3, w1_p, b_p, w2_p)

    return out[:batch_size, :dim]


if __name__ == "__main__":
    key = jax.random.PRNGKey(0)
    dim = 32
    batch_size = 64            # queries
    num_nodes = 8              # nodes per query (1 target + 7 non-targets)
    num_anchors = 3            # index of the (single) target node inside each query

    k_e, k_w1, k_b1, k_w2, k_b2 = jax.random.split(key, 5)
    embs = jax.random.normal(k_e, (batch_size * num_nodes, dim), jnp.float32)
    batch_idx = jnp.repeat(jnp.arange(batch_size, dtype=jnp.int32), num_nodes)

    # PyTorch Linear(2d, d) weight is (d, 2d); we store it transposed as (2d, d).
    lim1 = 1.0 / np.sqrt(2 * dim)
    w1 = jax.random.uniform(k_w1, (2 * dim, dim), jnp.float32, -lim1, lim1)
    b1 = jax.random.uniform(k_b1, (dim,), jnp.float32, -lim1, lim1)
    lim2 = 1.0 / np.sqrt(dim)
    w2 = jax.random.uniform(k_w2, (dim, dim), jnp.float32, -lim2, lim2)
    b2 = jax.random.uniform(k_b2, (dim,), jnp.float32, -lim2, lim2)

    # query_tile=16 -> grid=(4,): TB*N = 128 MXU rows per step and >=2 balanced
    # steps per TensorCore on v7x.  Default query_tile=64 targets 512 rows/step.
    out = target_mlp_readout(embs, batch_idx, batch_size, num_nodes, num_anchors,
                             w1, b1, w2, b2, query_tile=16)
    out = jax.block_until_ready(out)

    # ---- pure-JAX reference: module-order math on the same bf16-rounded operands ----
    q = lambda a: a.astype(jnp.bfloat16).astype(jnp.float32)   # kernel's MXU operand cast
    nt_idx = np.asarray([i for i in range(num_nodes) if i != num_anchors])
    e = q(embs).reshape(batch_size, num_nodes, dim)
    ntg = e[:, nt_idx, :]
    tg = jnp.broadcast_to(e[:, num_anchors:num_anchors + 1, :], ntg.shape)
    xr = jnp.concatenate([tg, ntg], -1).reshape(-1, 2 * dim)
    hr = jnp.maximum(xr @ q(w1) + b1, 0.0)
    yr = hr @ w2 + b2                          # Linear2 stays f32 in the kernel too
    bir = batch_idx.reshape(batch_size, num_nodes)[:, nt_idx].reshape(-1)
    ref = jax.ops.segment_sum(yr, bir, num_segments=batch_size)

    assert out.shape == (batch_size, dim)
    assert jnp.allclose(out, ref, atol=2e-2, rtol=2e-2), "mismatch vs reference"
    print("KERNEL_OK")
</pallas_src>

<mosaic_0001>
module attributes {stable_mosaic.version = 11 : i64} {
  func.func @_readout_kernel(%arg0: i32, %arg1: memref<16x8x32xf32, #tpu.memory_space<vmem>>, %arg2: memref<64x128xbf16, #tpu.memory_space<vmem>>, %arg3: memref<2x128xf32, #tpu.memory_space<vmem>>, %arg4: memref<128x128xf32, #tpu.memory_space<vmem>>, %arg5: memref<16x128xf32, #tpu.memory_space<vmem>>) attributes {dimension_semantics = [#tpu.dimension_semantics<parallel>], iteration_bounds = array<i64: 4>, scalar_prefetch = 0 : i64, scratch_operands = 0 : i64, tpu.core_type = #tpu.core_type<tc>, window_params = [{transform_indices = @transform_0, window_bounds = array<i64: 16, 8, 32>}, {pipeline_mode = #tpu.pipeline_mode<synchronous>, transform_indices = @transform_1, window_bounds = array<i64: 64, 128>}, {pipeline_mode = #tpu.pipeline_mode<synchronous>, transform_indices = @transform_2, window_bounds = array<i64: 2, 128>}, {pipeline_mode = #tpu.pipeline_mode<synchronous>, transform_indices = @transform_3, window_bounds = array<i64: 128, 128>}, {transform_indices = @transform_4, window_bounds = array<i64: 16, 128>}]} {
    %c0 = arith.constant 0 : index
    %c0_0 = arith.constant 0 : index
    %c0_1 = arith.constant 0 : index
    %0 = vector.load %arg1[%c0, %c0_0, %c0_1] : memref<16x8x32xf32, #tpu.memory_space<vmem>>, vector<16x8x32xf32>
    %1 = vector.shape_cast %0 : vector<16x8x32xf32> to vector<128x32xf32>
    %2 = arith.truncf %1 : vector<128x32xf32> to vector<128x32xbf16>
    %3 = vector.extract_strided_slice %0 {offsets = [0, 3, 0], sizes = [16, 1, 32], strides = [1, 1, 1]} : vector<16x8x32xf32> to vector<16x1x32xf32>
    %4 = vector.shape_cast %3 : vector<16x1x32xf32> to vector<16x32xf32>
    %5 = arith.truncf %4 : vector<16x32xf32> to vector<16x32xbf16>
    %c0_2 = arith.constant 0 : index
    %c0_3 = arith.constant 0 : index
    %6 = vector.load %arg2[%c0_2, %c0_3] : memref<64x128xbf16, #tpu.memory_space<vmem>>, vector<32x128xbf16>
    %c32 = arith.constant 32 : index
    %c0_4 = arith.constant 0 : index
    %7 = vector.load %arg2[%c32, %c0_4] : memref<64x128xbf16, #tpu.memory_space<vmem>>, vector<32x128xbf16>
    %c0_5 = arith.constant 0 : index
    %c0_6 = arith.constant 0 : index
    %8 = vector.load %arg3[%c0_5, %c0_6] : memref<2x128xf32, #tpu.memory_space<vmem>>, vector<1x128xf32>
    %c1 = arith.constant 1 : index
    %c0_7 = arith.constant 0 : index
    %9 = vector.load %arg3[%c1, %c0_7] : memref<2x128xf32, #tpu.memory_space<vmem>>, vector<1x128xf32>
    %cst = arith.constant dense<0.000000e+00> : vector<128x128xf32>
    %10 = tpu.matmul %2, %7, %cst {dimension_numbers = #tpu.dot_dimension_numbers<[1], [0], [0], [1], [0, 0, 1, 1], [], []>} : vector<128x32xbf16>, vector<32x128xbf16>, vector<128x128xf32> -> vector<128x128xf32>
    %11 = vector.shape_cast %10 : vector<128x128xf32> to vector<16x8x128xf32>
    %cst_8 = arith.constant dense<0.000000e+00> : vector<16x128xf32>
    %12 = tpu.matmul %5, %6, %cst_8 {dimension_numbers = #tpu.dot_dimension_numbers<[1], [0], [0], [1], [0, 0, 1, 1], [], []>} : vector<16x32xbf16>, vector<32x128xbf16>, vector<16x128xf32> -> vector<16x128xf32>
    %13 = vector.shape_cast %12 : vector<16x128xf32> to vector<16x1x128xf32>
    %14 = vector.broadcast %13 : vector<16x1x128xf32> to vector<16x8x128xf32>
    %15 = arith.addf %11, %14 : vector<16x8x128xf32>
    %16 = vector.shape_cast %8 : vector<1x128xf32> to vector<1x1x128xf32>
    %17 = vector.broadcast %16 : vector<1x1x128xf32> to vector<16x8x128xf32>
    %18 = arith.addf %15, %17 : vector<16x8x128xf32>
    %cst_9 = arith.constant 0.000000e+00 : f32
    %19 = vector.broadcast %cst_9 : f32 to vector<16x8x128xf32>
    %20 = arith.maximumf %18, %19 : vector<16x8x128xf32>
    %cst_10 = arith.constant dense<0.000000e+00> : vector<16x128xf32>
    %21 = vector.multi_reduction <add>, %20, %cst_10 [1] : vector<16x8x128xf32> to vector<16x128xf32>
    %22 = vector.extract_strided_slice %20 {offsets = [0, 3, 0], sizes = [16, 1, 128], strides = [1, 1, 1]} : vector<16x8x128xf32> to vector<16x1x128xf32>
    %23 = vector.shape_cast %22 : vector<16x1x128xf32> to vector<16x128xf32>
    %24 = arith.subf %21, %23 : vector<16x128xf32>
    %c0_11 = arith.constant 0 : index
    %c0_12 = arith.constant 0 : index
    %25 = vector.load %arg4[%c0_11, %c0_12] : memref<128x128xf32, #tpu.memory_space<vmem>>, vector<128x128xf32>
    %cst_13 = arith.constant dense<0.000000e+00> : vector<16x128xf32>
    %26 = tpu.matmul %24, %25, %cst_13 {dimension_numbers = #tpu.dot_dimension_numbers<[1], [0], [0], [1], [0, 0, 1, 1], [], []>} : vector<16x128xf32>, vector<128x128xf32>, vector<16x128xf32> -> vector<16x128xf32>
    %27 = vector.broadcast %9 : vector<1x128xf32> to vector<16x128xf32>
    %28 = arith.addf %26, %27 : vector<16x128xf32>
    %c0_14 = arith.constant 0 : index
    %c0_15 = arith.constant 0 : index
    %29 = vector.load %arg5[%c0_14, %c0_15] : memref<16x128xf32, #tpu.memory_space<vmem>>, vector<16x128xf32>
    tpu.vector_store %arg5[%c0_14, %c0_15], %28 {strides = array<i32>} : memref<16x128xf32, #tpu.memory_space<vmem>>, vector<16x128xf32>,
    return
  }
  func.func @transform_0(%arg0: i32) -> (i32, i32, i32) {
    %c0_i32 = arith.constant 0 : i32
    %c0_i32_0 = arith.constant 0 : i32
    %c0_i32_1 = arith.constant 0 : i32
    return %arg0, %c0_i32, %c0_i32_0 : i32, i32, i32
  }
  func.func @transform_1(%arg0: i32) -> (i32, i32) {
    %c0_i32 = arith.constant 0 : i32
    %c0_i32_0 = arith.constant 0 : i32
    %c0_i32_1 = arith.constant 0 : i32
    return %c0_i32, %c0_i32_0 : i32, i32
  }
  func.func @transform_2(%arg0: i32) -> (i32, i32) {
    %c0_i32 = arith.constant 0 : i32
    %c0_i32_0 = arith.constant 0 : i32
    %c0_i32_1 = arith.constant 0 : i32
    return %c0_i32, %c0_i32_0 : i32, i32
  }
  func.func @transform_3(%arg0: i32) -> (i32, i32) {
    %c0_i32 = arith.constant 0 : i32
    %c0_i32_0 = arith.constant 0 : i32
    %c0_i32_1 = arith.constant 0 : i32
    return %c0_i32, %c0_i32_0 : i32, i32
  }
  func.func @transform_4(%arg0: i32) -> (i32, i32) {
    %c0_i32 = arith.constant 0 : i32
    %c0_i32_0 = arith.constant 0 : i32
    return %arg0, %c0_i32 : i32, i32
  }
}

</mosaic_0001>

<bundles_post_ra>
// kernel: tpu_custom_call.1
= control target key start
LH: loop header
LB: loop body
LE: loop exit
PB: predicated region body
PF: predicated region fallthrough
CT: control target
= control target key end

     0   :  { %9 = vsyncpa [#allocation3], 0  ;;  %s1725_s0 = inlined_call_operand.vmem [shape: f32[64,8,32], index: 0, kind: input, shape index: {}]   ;;  %s1726_s1 = inlined_call_operand.vmem [shape: bf16[64,128], index: 1, kind: input, shape index: {}]   ;;  %s1727_s2 = inlined_call_operand.vmem [shape: f32[2,128], index: 2, kind: input, shape index: {}]   ;;  %s1728_s3 = inlined_call_operand.vmem [shape: f32[128,128], index: 3, kind: input, shape index: {}]   ;;  %s1729_s4 = inlined_call_operand.hbm [shape: f32[64,128], index: 4, kind: output, shape index: {}]  }
   0x1   :  { %11 = vsyncpa [#allocation3 + $0x1], 0  ;;  %s1334_s15 = smov 0   ;;  %s1336_s16 = smov 0  }
   0x2   :  { %s1338_s17 = smov 0   ;;  %s1340_s18 = smov 0  }
   0x3 LB: > { %s1355_s19 = sadd.s32 4294967295, %s1301_s18   ;;  %s1071_s20 = sadd.s32 4294967294, %s1301_s18   ;;  %s1301_s18 = sphi %s1340_s18, %s1735_s18   ;;  %s1297_s17 = sphi %s1338_s17, %s1734_s17   ;;  %s1293_s16 = sphi %s1336_s16, %s1733_s16   ;;  %s1289_s15 = sphi %s1334_s15, %s1732_s15  }
   0x4   : > { %s1359_s21 = sadd.s32 1, %s1301_s18   ;;  %s113_s22 = sadd.s32 1, %s1297_s17 }
   0x5   : > { %s110_s23 = ssub.s32 %s1301_s18, %s1359_s21  ;;  %p123_p0 = scmp.ne.s32.totalorder %s1297_s17, %s1293_s16 }
   0x6   : > { %p111_p1 = scmp.eq.s32.totalorder %s110_s23, 0  ;;  %p124_p2 = scmp.eq.s32.totalorder %s1355_s19, 3 }
   0x7   : > { %p129_p3 = scmp.ne.s32.totalorder %s1293_s16, %s1289_s15  ;;  %p130_p4 = scmp.eq.s32.totalorder %s1071_s20, 3 }
   0x8   : > { %s1370_s24 = scalar_select %p111_p1, %s1297_s17, %s113_s22  }
   0x9   : > { %p1372_p5 = por %p124_p2, %p123_p0  ;;  %p1376_p6 = por %p130_p4, %p129_p3 }
   0xa   : > { %p1074_p7 = scmp.ge.s32.totalorder %s1301_s18, 1  ;;  %p166_p8 = scmp.lt.s32.totalorder %s1301_s18, 5 }
   0xc   : > { %p167_p9 = pnand %p1074_p7, %p166_p8 }
   0xd   : > { %s1076_s29 = sshll.u32 (!%p167_p9), %s1355_s19, 4  ;;  %s189_s14 = sand.u32 (!%p167_p9), 1, %s1293_s16  }
   0xe   : > { %170 = sbr.rel (%p167_p9) target bundleno = 516 (0x204), region = 36  ;;  %p193_p10 = scmp.lt.s32.totalorder (!%p167_p9), %s1076_s29, 63 }
   0xf   : > { %s1075_s20 = sshll.u32 (!%p167_p9), %s189_s14, 4  ;;  %s1685_s7 = scalar_lea.sflag (!%p167_p9), [#allocation3], %s189_s14 }
  0x10   : > { %s191_s27 = scalar_lea.vmem (!%p167_p9), [#allocation2], %s1075_s20 }
  0x11   : > { %s1009_s28 = sshll.u32 (!%p167_p9), %s191_s27, 4  ;;  %s1678_s28 = int_to_ptr.vmem [resolvable:$true] %s1009_s28 }
  0x13   : > { %v1237_v0 = vld [vmem:[%s1726_s1 + $0x18] sm:$0xff]   ;;  %v1238_v1 = vld [vmem:[%s1726_s1 + $0x10] sm:$0xff]   ;;  %s1737_s29 = smov (!%p193_p10, %s1076_s29), 63  ;;  %v1239_v2 = vld [vmem:[%s1726_s1 + $0x8] sm:$0xff]   ;;  %v1303_v3 = vmov 0.0   ;;  %vm1304_vm0 = vmmov 0  }
  0x14   : > { %1130 = vmatprep.subr.bf16.mxu0 %v1237_v0  ;;  %1150 = vmatprep.subr.bf16.mxu1 %v1303_v3  ;;  %s1077_s8 = sshll.u32 %s1737_s29, 3  ;;  %v1240_v4 = vld [vmem:[%s1726_s1] sm:$0xff]   ;;  %vm262_vm1 = vcmask 261120   ;;  %vm418_vm2 = vcmask 1041409   ;;  %vm421_vm3 = vcmask 1042434   ;;  %vm423_vm4 = vcmask 1043459  }
  0x15   : > { %1131 = vmatpush3.bf16.msra.mxu0 %v1237_v0  ;;  %1151 = vmatpush3.bf16.msra.mxu1 %v1239_v2  ;;  %s1398_s13 = scalar_lea.vmem %s1725_s0, %s1077_s8  ;;  %vm426_vm5 = vcmask 1044484   ;;  %vm429_vm6 = vcmask 1045509   ;;  %vm432_vm7 = vcmask 1046534   ;;  %vm435_vm8 = vcmask 1047559   ;;  %s1098_s29 = sshll.u32 %s1355_s19, 8 }
  0x16   : > { %1132 = vmatprep.subr.bf16.mxu0 %v1238_v1  ;;  %1154 = vmatprep.mubr.msk.bf16.mxu1 %vm1304_vm0, %v1303_v3  ;;  %v200_v5 = vld [vmem:[%s1398_s13] sm:$0xff]  ;;  %v201_v6 = vld [vmem:[%s1398_s13 + $0x8] sm:$0xff]  ;;  %v202_v13 = vld [vmem:[%s1398_s13 + $0x10] sm:$0xff]  ;;  %s1683_s6 = scalar_lea.hbm %s1729_s4, %s1098_s29  ;;  %s1241_s8 = scalar_lea.vmem %s1678_s28, 256 }
  0x17   : > { %1152 = vmatprep.subr.bf16.mxu1 %v1303_v3  ;;  %v1403_v7 = vld [vmem:[%s1398_s13 + $0x40] sm:$0xff]  ;;  %v1406_v8 = vld [vmem:[%s1398_s13 + $0x48] sm:$0xff]  ;;  %v216_v9 = vpack.c.bf16 %v201_v6, %v200_v5  ;;  %v224_v10 = vpack.c.bf16 %v200_v5, %v200_v5  ;;  %v225_v11 = vpack.c.bf16 %v201_v6, %v201_v6  ;;  %v203_v14 = vld [vmem:[%s1398_s13 + $0x18] sm:$0xff]  ;;  %v226_v17 = vpack.c.bf16 %v202_v13, %v202_v13  ;;  %p1242_p11 = scmp.ne.s32.totalorder %s1678_s28, %s1241_s8  ;;  %s1306_s19 = smov [#allocation2]  }
  0x18   : > { %v232_v12 = vpack.c.bf16 %v1403_v7, %v1403_v7  ;;  %v233_v15 = vpack.c.bf16 %v1406_v8, %v1406_v8  ;;  %v217_v16 = vpack.c.bf16 %v203_v14, %v202_v13  ;;  %v227_v18 = vpack.c.bf16 %v203_v14, %v203_v14  ;;  %v204_v19 = vld [vmem:[%s1398_s13 + $0x20] sm:$0xff]  ;;  %v205_v20 = vld [vmem:[%s1398_s13 + $0x28] sm:$0xff]  ;;  %v206_v29 = vld [vmem:[%s1398_s13 + $0x30] sm:$0xff]  ;;  %s1245_s9 = sshll.u32 %s1306_s19, 4  ;;  %s1246_s9 = int_to_ptr.vmem [resolvable:$false] %s1245_s9 }
  0x19   : > { %1133 = vmatpush3.bf16.msra.mxu0 %v1238_v1  ;;  %1153 = vmatpush3.bf16.msra.mxu1 %v1240_v4  ;;  %v400_v21 = vunpack.c.l.b16 %v224_v10  ;;  %v401_v22 = vunpack.c.l.b16 %v225_v11  ;;  %v218_v24 = vpack.c.bf16 %v205_v20, %v204_v19  ;;  %v402_v26 = vunpack.c.l.b16 %v226_v17  ;;  %v207_v30 = vld [vmem:[%s1398_s13 + $0x38] sm:$0xff]  ;;  %v210_v35 = vld [vmem:[%s1398_s13 + $0x50] sm:$0xff]  ;;  %v212_v44 = vld [vmem:[%s1398_s13 + $0x60] sm:$0xff]  ;;  %p1243_p12 = pnand %p1242_p11, %p1372_p5  ;;  %s1247_s10 = scalar_lea.vmem %s1246_s9, 512 }
  0x1a   : > { %1134 = vmatprep.mubr.msk.bf16.mxu0 %vm262_vm1, %v216_v9  ;;  %v408_v23 = vunpack.c.l.b16 %v232_v12  ;;  %v409_v25 = vunpack.c.l.b16 %v233_v15  ;;  %v403_v27 = vunpack.c.l.b16 %v227_v18  ;;  %v228_v28 = vpack.c.bf16 %v204_v19, %v204_v19  ;;  %v211_v43 = vld [vmem:[%s1398_s13 + $0x58] sm:$0xff]  ;;  %v213_v45 = vld [vmem:[%s1398_s13 + $0x68] sm:$0xff]  ;;  %v214_v49 = vld [vmem:[%s1398_s13 + $0x70] sm:$0xff]  ;;  %p1248_p0 = scmp.lt.s32.totalorder %s1678_s28, %s1246_s9  ;;  %p1249_p1 = scmp.lt.s32.totalorder %s1247_s10, %s1241_s8 }
  0x1b   : > { %v416_v31 = vrot.slane %v400_v21, 3  ;;  %v417_v32 = vrot.slane %v401_v22, 2  ;;  %v229_v34 = vpack.c.bf16 %v205_v20, %v205_v20  ;;  %v420_v37 = vrot.slane %v402_v26, 1  ;;  %v215_v50 = vld [vmem:[%s1398_s13 + $0x78] sm:$0xff]  ;;  %p1244_p13 = pneg %p1243_p12 }
  0x1c   : > { %1135 = vmatmul.mubr.msk.bf16.vlgmr.msra.gmra.mxu0 %vm262_vm1, %v217_v16  ;;  %v437_v33 = vrot.slane %v408_v23, 3  ;;  %v438_v36 = vrot.slane %v409_v25, 2  ;;  %v404_v38 = vunpack.c.l.b16 %v228_v28  ;;  %v230_v41 = vpack.c.bf16 %v206_v29, %v206_v29  ;;  %v867_v26 = vld [vmem:[%s1728_s3 + $0x78] sm:$0xff]  ;;  %v865_v28 = vld [vmem:[%s1728_s3 + $0x68] sm:$0xff]  ;;  %p1250_p2 = por %p1249_p1, %p1248_p0 }
  0x1d   : > { %1138 = vmatprep.mubr.msk.bf16.mxu0 %vm262_vm1, %v218_v24  ;;  %v419_v39 = vsel %vm418_vm2, %v417_v32, %v416_v31  ;;  %v405_v40 = vunpack.c.l.b16 %v229_v34  ;;  %v231_v42 = vpack.c.bf16 %v207_v30, %v207_v30  ;;  %v219_v48 = vpack.c.bf16 %v207_v30, %v206_v29  ;;  %1158 = vmatprep.subr.mxu0 %v867_v26  ;;  %v864_v29 = vld [vmem:[%s1728_s3 + $0x60] sm:$0xff]  ;;  %v863_v30 = vld [vmem:[%s1728_s3 + $0x58] sm:$0xff]  ;;  %v862_v31 = vld [vmem:[%s1728_s3 + $0x50] sm:$0xff] }
  0x1e   : > { %v422_v46 = vsel %vm421_vm3, %v420_v37, %v419_v39  ;;  %v425_v47 = vrot.slane %v404_v38, 7  ;;  %v234_v51 = vpack.c.bf16 %v210_v35, %v210_v35  ;;  %v439_v52 = vsel %vm418_vm2, %v438_v36, %v437_v33  ;;  %1159 = vmatpush3.msra.mxu0 %v867_v26  ;;  %v861_v32 = vld [vmem:[%s1728_s3 + $0x48] sm:$0xff]  ;;  %v860_v33 = vld [vmem:[%s1728_s3 + $0x40] sm:$0xff]  ;;  %v859_v34 = vld [vmem:[%s1728_s3 + $0x38] sm:$0xff]  ;;  %p1251_p3 = pnand %p1250_p2, %p1244_p13 }
  0x1f   : > { %v424_v53 = vsel %vm423_vm4, %v403_v27, %v422_v46  ;;  %v428_v54 = vrot.slane %v405_v40, 6  ;;  %v406_v55 = vunpack.c.l.b16 %v230_v41  ;;  %v235_v57 = vpack.c.bf16 %v211_v43, %v211_v43  ;;  %v866_v27 = vld [vmem:[%s1728_s3 + $0x70] sm:$0xff]  ;;  %v857_v36 = vld [vmem:[%s1728_s3 + $0x28] sm:$0xff]  ;;  %v856_v37 = vld [vmem:[%s1728_s3 + $0x20] sm:$0xff] }
  0x20   : > { %v427_v56 = vsel %vm426_vm5, %v425_v47, %v424_v53  ;;  %v236_v58 = vpack.c.bf16 %v212_v44, %v212_v44  ;;  %v237_v59 = vpack.c.bf16 %v213_v45, %v213_v45  ;;  %v407_v60 = vunpack.c.l.b16 %v231_v42  ;;  %1160 = vmatprep.subr.mxu0 %v866_v27  ;;  %v855_v38 = vld [vmem:[%s1728_s3 + $0x18] sm:$0xff]  ;;  %v854_v39 = vld [vmem:[%s1728_s3 + $0x10] sm:$0xff]  ;;  %v853_v40 = vld [vmem:[%s1728_s3 + $0x8] sm:$0xff] }
  0x21   : > { %v431_v61 = vrot.slane %v406_v55, 5  ;;  %v238_v62 = vpack.c.bf16 %v214_v49, %v214_v49  ;;  %v239_v63 = vpack.c.bf16 %v215_v50, %v215_v50  ;;  %v410_v0 = vunpack.c.l.b16 %v234_v51  ;;  %1161 = vmatpush3.msra.mxu0 %v866_v27  ;;  %v852_v41 = vld [vmem:[%s1728_s3] sm:$0xff] }
  0x22   : > { %v411_v1 = vunpack.c.l.b16 %v235_v57  ;;  %v412_v2 = vunpack.c.l.b16 %v236_v58  ;;  %v413_v3 = vunpack.c.l.b16 %v237_v59  ;;  %v430_v6 = vsel %vm429_vm6, %v428_v54, %v427_v56  ;;  %1162 = vmatprep.subr.mxu0 %v865_v28 }
  0x23   : > { %v414_v4 = vunpack.c.l.b16 %v238_v62  ;;  %v415_v5 = vunpack.c.l.b16 %v239_v63  ;;  %v220_v9 = vpack.c.bf16 %v1406_v8, %v1403_v7  ;;  %v440_v10 = vrot.slane %v410_v0, 1  ;;  %1163 = vmatpush3.msra.mxu0 %v865_v28 }
  0x24   : > { %1139 = vmatmul.mubr.msk.bf16.gmra.mxu0 %vm262_vm1, %v219_v48  ;;  %v443_v11 = vrot.slane %v412_v2, 7  ;;  %v434_v12 = vrot.slane %v407_v60, 4  ;;  %v445_v13 = vrot.slane %v413_v3, 6  ;;  %v433_v14 = vsel %vm432_vm7, %v431_v61, %v430_v6  ;;  %1164 = vmatprep.subr.mxu0 %v864_v29 }
  0x25   : > { %1142 = vmatprep.mubr.msk.bf16.mxu0 %vm262_vm1, %v220_v9  ;;  %v441_v15 = vsel %vm421_vm3, %v440_v10, %v439_v52  ;;  %v447_v16 = vrot.slane %v414_v4, 5  ;;  %v221_v17 = vpack.c.bf16 %v211_v43, %v210_v35  ;;  %v449_v19 = vrot.slane %v415_v5, 4  ;;  %1165 = vmatpush3.msra.mxu0 %v864_v29  ;;  %v858_v35 = vld [vmem:[%s1728_s3 + $0x30] sm:$0xff]  ;;  %v1514_v10 = vld [vmem:[%s1727_s2] ss:$0 sm:$0xff] }
  0x26   : > { %v442_v18 = vsel %vm423_vm4, %v411_v1, %v441_v15  ;;  %v222_v20 = vpack.c.bf16 %v213_v45, %v212_v44  ;;  %v436_v7 = vsel %vm435_vm8, %v434_v12, %v433_v14  ;;  %v223_v25 = vpack.c.bf16 %v215_v50, %v214_v49  ;;  %1166 = vmatprep.subr.mxu0 %v863_v30 }
  0x27   : > { %v444_v21 = vsel %vm426_vm5, %v443_v11, %v442_v18  ;;  %1167 = vmatpush3.msra.mxu0 %v863_v30  ;;  %v1305_v47 = vmov 1966171168   ;;  %v514_v49 = vlaneseq }
  0x28   : > { %v446_v8 = vsel %vm429_vm6, %v445_v13, %v444_v21  ;;  %1168 = vmatprep.subr.mxu0 %v862_v31  ;;  %v512_v48 = vunpack.c.l.s4 %v1305_v47 }
  0x29   : > { %v448_v22 = vsel %vm432_vm7, %v447_v16, %v446_v8  ;;  %1169 = vmatpush3.msra.mxu0 %v862_v31  ;;  %v515_v52 = vshrl.u32 %v514_v49, 7 }
  0x2a   : > { %v450_v23 = vsel %vm435_vm8, %v449_v19, %v448_v22  ;;  %1170 = vmatprep.subr.mxu0 %v861_v32  ;;  %v513_v51 = vunpack.c.0.s8 %v512_v48 }
  0x2b   : > { %v451_v24 = vpack.c.b16 %v450_v23, %v436_v7  ;;  %1171 = vmatpush3.msra.mxu0 %v861_v32  ;;  %v1502_v59 = vsub.s32 0, %v515_v52 }
  0x2c   : > { %1143 = vmatmul.mubr.msk.bf16.gmra.mxu0 %vm262_vm1, %v221_v17  ;;  %1172 = vmatprep.subr.mxu0 %v860_v33  ;;  %v1499_v54 = vsub.s32 %v513_v51, %v515_v52 }
  0x2d   : > { %1146 = vmatprep.mubr.msk.bf16.mxu0 %vm262_vm1, %v222_v20  ;;  %1155 = vmatmul.mubr.msk.bf16.vlgmr.msra.gmra.mxu1 %vm262_vm1, %v451_v24 }
  0x2e   : > { %1173 = vmatpush3.msra.mxu0 %v860_v33 }
  0x2f   : > { %1174 = vmatprep.subr.mxu0 %v859_v34 }
  0x30   : > { %1175 = vmatpush3.msra.mxu0 %v859_v34 }
  0x31   : > { %1176 = vmatprep.subr.mxu0 %v858_v35 }
  0x32   : > { %1177 = vmatpush3.msra.mxu0 %v858_v35 }
  0x33   : > { %1178 = vmatprep.subr.mxu0 %v857_v36 }
  0x34   : > { %1147 = vmatmul.mubr.msk.bf16.gmra.mxu0 %vm262_vm1, %v223_v25 }
  0x35   : > { %1179 = vmatpush3.msra.mxu0 %v857_v36 }
  0x36   : > { %1180 = vmatprep.subr.mxu0 %v856_v37 }
  0x37   : > { %1181 = vmatpush3.msra.mxu0 %v856_v37 }
  0x38   : > { %1182 = vmatprep.subr.mxu0 %v855_v38 }
  0x39   : > { %1183 = vmatpush3.msra.mxu0 %v855_v38 }
  0x3a   : > { %1184 = vmatprep.subr.mxu0 %v854_v39 }
  0x3b   : > { %1185 = vmatpush3.msra.mxu0 %v854_v39 }
  0x3c   : > { %1186 = vmatprep.subr.mxu0 %v853_v40 }
  0x3d   : > { %1187 = vmatpush3.msra.mxu0 %v853_v40 }
  0x3e   : > { %1188 = vmatprep.subr.mxu0 %v852_v41 }
  0x3f   : > { %1189 = vmatpush3.msra.mxu0 %v852_v41 }
  0xdc   : > { %v1136_v42 = vpop.f32.mrf.mxu0 }
  0xde   : > { %v321_v43 = vpop.f32.mrf.mxu0 }
  0xe0   : > { %v1137_v44 = vpop.f32.mrf.mxu0 }
  0xe2   : > { %v324_v45 = vpop.f32.mrf.mxu0 }
  0xe4   : > { %v1140_v46 = vpop.f32.mrf.mxu0 }
  0xe6   : > { %v337_v50 = vpop.f32.mrf.mxu0 }
  0xe8   : > { %v1497_v53 = vpop.f32.mrf.mxu0 }
  0xea   : > { %v340_v58 = vpop.f32.mrf.mxu0 }
  0xec   : > { %v1508_v5 = vpop.f32.mrf.mxu0 }
  0xed   : > { %v501_v55 = vpop.f32.mrf.mxu1 }
  0xee   : > { %v510_v56 = vcombine.high %v501_v55, %v501_v55  ;;  %v517_v57 = vrot.slane %v501_v55, %v1499_v54  ;;  %v353_v7 = vpop.f32.mrf.mxu0 }
  0xef   : > { %v1156_v60 = vpop.f32.mrf.mxu1 }
  0xf0   : > { %v524_v61 = vrot.slane %v510_v56, %v1499_v54  ;;  %v525_v62 = vcombine.high %v517_v57, %v517_v57  ;;  %v533_v63 = vrot.slane %v517_v57, %v1499_v54  ;;  %v1145_v37 = vpop.f32.mrf.mxu0 }
  0xf1   : > { %v504_v0 = vpop.f32.mrf.mxu1 }
  0xf2   : > { %v526_v1 = vcombine.high %v524_v61, %v524_v61  ;;  %v540_v2 = vrot.slane %v524_v61, %v1499_v54  ;;  %v547_v3 = vrot.slane %v525_v62, %v1499_v54  ;;  %v555_v4 = vcombine.high %v533_v63, %v533_v63  ;;  %v356_v56 = vpop.f32.mrf.mxu0 }
  0xf3   : > { %v611_v6 = vrot.slane %v533_v63, %v1502_v59  ;;  %v1157_v9 = vpop.f32.mrf.mxu1  ;;  %v566_v28 = vrot.slane %v504_v0, %v1499_v54  ;;  %v559_v32 = vcombine.high %v504_v0, %v504_v0 }
  0xf4   : > { %v556_v11 = vcombine.high %v540_v2, %v540_v2  ;;  %v557_v12 = vcombine.high %v547_v3, %v547_v3  ;;  %v615_v13 = vrot.slane %v547_v3, %v1502_v59  ;;  %v619_v14 = vrot.slane %v555_v4, %v1502_v59 }
  0xf5   : > { %v627_v15 = vrot.slane %v540_v2, %v1502_v59  ;;  %v688_v16 = vadd.f32 %v611_v6, %v321_v43  ;;  %v554_v17 = vrot.slane %v526_v1, %v1499_v54  ;;  %v1549_v49 = vrot.slane %v559_v32, %v1499_v54 }
  0xf6   : > { %v623_v18 = vrot.slane %v557_v12, %v1502_v59  ;;  %v635_v19 = vrot.slane %v556_v11, %v1502_v59  ;;  %v689_v20 = vadd.f32 %v615_v13, %v324_v45  ;;  %v690_v21 = vadd.f32 %v1136_v42, %v619_v14  ;;  %v1148_v13 = vpop.f32.mrf.mxu0 }
  0xf7   : > { %v692_v8 = vadd.f32 %v627_v15, %v337_v50  ;;  %v708_v22 = vadd.f32 %v1514_v10, %v688_v16  ;;  %v558_v23 = vcombine.high %v554_v17, %v554_v17  ;;  %v631_v24 = vrot.slane %v554_v17, %v1502_v59 }
  0xf8   : > { %v691_v25 = vadd.f32 %v1137_v44, %v623_v18  ;;  %v709_v26 = vadd.f32 %v1514_v10, %v689_v20  ;;  %v710_v27 = vadd.f32 %v1514_v10, %v690_v21  ;;  %v694_v33 = vadd.f32 %v1140_v46, %v635_v19 }
  0xf9   : > { %v712_v29 = vadd.f32 %v1514_v10, %v692_v8  ;;  %v1528_v30 = vmax.f32 %v708_v22, 0.0  ;;  %v693_v31 = vadd.f32 %v631_v24, %v340_v58  ;;  %v639_v40 = vrot.slane %v558_v23, %v1502_v59 }
  0xfa   : > { %v711_v34 = vadd.f32 %v1514_v10, %v691_v25  ;;  %v1531_v35 = vmax.f32 %v709_v26, 0.0  ;;  %v1533_v36 = vmax.f32 %v710_v27, 0.0  ;;  %v574_v45 = vcombine.high %v566_v28, %v566_v28 }
  0xfb   : > { %v1535_v38 = vmax.f32 %v712_v29, 0.0  ;;  %v740_v39 = vrot.slane %v1528_v30, 4  ;;  %v713_v41 = vadd.f32 %v1514_v10, %v693_v31  ;;  %v582_v55 = vrot.slane %v566_v28, %v1499_v54  ;;  %v369_v29 = vpop.f32.mrf.mxu0 }
  0xfc   : > { %v1540_v42 = vmax.f32 %v711_v34, 0.0  ;;  %v746_v43 = vrot.slane %v1531_v35, 4  ;;  %v752_v44 = vrot.slane %v1533_v36, 4  ;;  %v1556_v57 = vadd.f32 %v1514_v10, %v694_v33 }
  0xfd   : > { %v741_v46 = vadd.f32 %v740_v39, %v1528_v30  ;;  %v764_v47 = vrot.slane %v1535_v38, 4  ;;  %v1546_v48 = vmax.f32 %v713_v41, 0.0  ;;  %v1559_v60 = vadd.f32 %v1497_v53, %v639_v40 }
  0xfe   : > { %v747_v50 = vadd.f32 %v746_v43, %v1531_v35  ;;  %v753_v51 = vadd.f32 %v752_v44, %v1533_v36  ;;  %v758_v52 = vrot.slane %v1540_v42, 4  ;;  %v596_v1 = vrot.slane %v574_v45, %v1499_v54 }
  0xff   : > { %v742_v58 = vrot.slane %v741_v46, 2  ;;  %v770_v61 = vrot.slane %v1546_v48, 4  ;;  %v1563_v0 = vadd.f32 %v764_v47, %v1535_v38  ;;  %v589_v4 = vrot.slane %v1549_v49, %v1499_v54 }
 0x100   : > { %v748_v62 = vrot.slane %v747_v50, 2  ;;  %v754_v63 = vrot.slane %v753_v51, 2  ;;  %v604_v6 = vcombine.high %v582_v55, %v582_v55  ;;  %v1570_v53 = vadd.f32 %v758_v52, %v1540_v42 }
 0x101   : > { %v743_v2 = vadd.f32 %v742_v58, %v741_v46  ;;  %v771_v3 = vadd.f32 %v770_v61, %v1546_v48  ;;  %v643_v12 = vrot.slane %v582_v55, %v1502_v59  ;;  %v606_v17 = vcombine.high %v596_v1, %v596_v1 }
 0x102   : > { %v749_v9 = vadd.f32 %v748_v62, %v747_v50  ;;  %v755_v11 = vadd.f32 %v754_v63, %v753_v51  ;;  %v651_v16 = vrot.slane %v604_v6, %v1502_v59  ;;  %v647_v21 = vrot.slane %v596_v1, %v1502_v59 }
 0x103   : > { %v744_v14 = vrot.slane %v743_v2, 1  ;;  %v772_v15 = vrot.slane %v771_v3, 2  ;;  %v696_v20 = vadd.f32 %v643_v12, %v353_v7  ;;  %v655_v24 = vrot.slane %v606_v17, %v1502_v59 }
 0x104   : > { %v750_v18 = vrot.slane %v749_v9, 1  ;;  %v756_v19 = vrot.slane %v755_v11, 1  ;;  %v698_v23 = vadd.f32 %v1508_v5, %v651_v16  ;;  %v697_v28 = vadd.f32 %v647_v21, %v356_v56 }
 0x105   : > { %v745_v8 = vadd.f32 %v744_v14, %v743_v2  ;;  %v773_v22 = vadd.f32 %v772_v15, %v771_v3  ;;  %v716_v27 = vadd.f32 %v1514_v10, %v696_v20  ;;  %v699_v33 = vadd.f32 %v1145_v37, %v655_v24 }
 0x106   : > { %v751_v25 = vadd.f32 %v750_v18, %v749_v9  ;;  %v1577_v26 = vadd.f32 %v756_v19, %v755_v11  ;;  %v718_v7 = vadd.f32 %v1514_v10, %v698_v23  ;;  %v766_v34 = vrot.slane %v1563_v0, 2 }
 0x107   : > { %v836_v31 = vsub.f32 %v745_v8, %v1528_v30  ;;  %v774_v32 = vrot.slane %v773_v22, 1  ;;  %v575_v5 = vcombine.high %v1549_v49, %v1549_v49  ;;  %v1585_v39 = vmax.f32 %v716_v27, 0.0  ;;  %v1149_v49 = vpop.f32.mrf.mxu0 }
 0x108   : > { %v717_v40 = vadd.f32 %v1514_v10, %v697_v28  ;;  %v760_v41 = vrot.slane %v1570_v53, 2  ;;  %v837_v43 = vsub.f32 %v751_v25, %v1531_v35  ;;  %v1590_v44 = vmax.f32 %v718_v7, 0.0 }
 0x109   : > { %v719_v30 = vadd.f32 %v1514_v10, %v699_v33  ;;  %v838_v37 = vsub.f32 %v1577_v26, %v1533_v36  ;;  %v1595_v45 = vrot.slane %v836_v31, 3  ;;  %v788_v46 = vrot.slane %v1585_v39, 4  ;;  %v372_v11 = vpop.f32.mrf.mxu0 }
 0x10a   : > { %v1598_v47 = vmax.f32 %v717_v40, 0.0  ;;  %v1600_v50 = vadd.f32 %v774_v32, %v773_v22  ;;  %v800_v51 = vrot.slane %v1590_v44, 4  ;;  %v605_v35 = vcombine.high %v589_v4, %v589_v4 }
 0x10b   : > { %v1603_v52 = vmax.f32 %v719_v30, 0.0  ;;  %v789_v55 = vadd.f32 %v788_v46, %v1585_v39  ;;  %v659_v36 = vrot.slane %v589_v4, %v1502_v59  ;;  %v603_v58 = vrot.slane %v575_v5, %v1499_v54 }
 0x10c   : > { %v794_v56 = vrot.slane %v1598_v47, 4  ;;  %v1609_v61 = vrot.slane %v837_v43, 2  ;;  %v801_v62 = vadd.f32 %v800_v51, %v1590_v44  ;;  %v667_v1 = vrot.slane %v605_v35, %v1502_v59 }
 0x10d   : > { %v806_v63 = vrot.slane %v1603_v52, 4  ;;  %v790_v2 = vrot.slane %v789_v55, 2  ;;  %v700_v6 = vadd.f32 %v659_v36, %v369_v29  ;;  %v607_v9 = vcombine.high %v603_v58, %v603_v58 }
 0x10e   : > { %v795_v3 = vadd.f32 %v794_v56, %v1598_v47  ;;  %v802_v12 = vrot.slane %v801_v62, 2  ;;  %v702_v4 = vadd.f32 %v1148_v13, %v667_v1  ;;  %v663_v54 = vrot.slane %v603_v58, %v1502_v59 }
 0x10f   : > { %v807_v14 = vadd.f32 %v806_v63, %v1603_v52  ;;  %v791_v15 = vadd.f32 %v790_v2, %v789_v55  ;;  %v720_v17 = vadd.f32 %v1514_v10, %v700_v6  ;;  %v671_v18 = vrot.slane %v607_v9, %v1502_v59 }
 0x110   : > { %v796_v16 = vrot.slane %v795_v3, 2  ;;  %v803_v19 = vadd.f32 %v802_v12, %v801_v62  ;;  %v722_v21 = vadd.f32 %v1514_v10, %v702_v4  ;;  %v701_v8 = vadd.f32 %v663_v54, %v372_v11 }
 0x111   : > { %v808_v20 = vrot.slane %v807_v14, 2  ;;  %v792_v22 = vrot.slane %v791_v15, 1  ;;  %v1620_v24 = vmax.f32 %v720_v17, 0.0  ;;  %v703_v25 = vadd.f32 %v1149_v49, %v671_v18 }
 0x112   : > { %v797_v23 = vadd.f32 %v796_v16, %v795_v3  ;;  %v804_v26 = vrot.slane %v803_v19, 1  ;;  %v1622_v27 = vmax.f32 %v722_v21, 0.0  ;;  %v721_v28 = vadd.f32 %v1514_v10, %v701_v8 }
 0x113   : > { %v809_v13 = vadd.f32 %v808_v20, %v807_v14  ;;  %v793_v29 = vadd.f32 %v792_v22, %v791_v15  ;;  %v812_v59 = vrot.slane %v1620_v24, 4  ;;  %v723_v32 = vadd.f32 %v1514_v10, %v703_v25 }
 0x114   : > { %v798_v31 = vrot.slane %v797_v23, 1  ;;  %v805_v7 = vadd.f32 %v804_v26, %v803_v19  ;;  %v824_v5 = vrot.slane %v1622_v27, 4  ;;  %v737_v40 = vmax.f32 %v721_v28, 0.0 }
 0x115   : > { %v810_v33 = vrot.slane %v809_v13, 1  ;;  %v844_v43 = vsub.f32 %v793_v29, %v1585_v39  ;;  %v813_v46 = vadd.f32 %v812_v59, %v1620_v24  ;;  %v1630_v49 = vmax.f32 %v723_v32, 0.0 }
 0x116   : > { %v799_v30 = vadd.f32 %v798_v31, %v797_v23  ;;  %v891_v51 = vrot.slane %v838_v37, 1  ;;  %v841_v35 = vsub.f32 %v1600_v50, %v1546_v48  ;;  %v825_v55 = vadd.f32 %v824_v5, %v1622_v27  ;;  %v1092_v50 = vld [vmem:[%s1727_s2 + $0x1] ss:$0 sm:$0xff] }
 0x117   : > { %v818_v56 = vrot.slane %v737_v40, 4  ;;  %v846_v36 = vsub.f32 %v805_v7, %v1590_v44  ;;  %v814_v62 = vrot.slane %v813_v46, 2  ;;  %v830_v63 = vrot.slane %v1630_v49, 4 }
 0x118   : > { %v845_v58 = vsub.f32 %v799_v30, %v1598_v47  ;;  %v902_v39 = vrot.slane %v844_v43, 3  ;;  %v811_v1 = vadd.f32 %v810_v33, %v809_v13  ;;  %v826_v2 = vrot.slane %v825_v55, 2 }
 0x119   : > { %v819_v3 = vadd.f32 %v818_v56, %v737_v40  ;;  %v815_v9 = vadd.f32 %v814_v62, %v813_v46  ;;  %v831_v37 = vadd.f32 %v830_v63, %v1630_v49  ;;  %v715_v11 = vadd.f32 %v1514_v10, %v1559_v60 }
 0x11a   : > { %v903_v6 = vrot.slane %v845_v58, 2  ;;  %v827_v12 = vadd.f32 %v826_v2, %v825_v55  ;;  %v730_v44 = vmax.f32 %v1556_v57, 0.0  ;;  %v761_v47 = vadd.f32 %v760_v41, %v1570_v53 }
 0x11b   : > { %v820_v14 = vrot.slane %v819_v3, 2  ;;  %v905_v4 = vrot.slane %v846_v36, 1  ;;  %v816_v54 = vrot.slane %v815_v9, 1  ;;  %v832_v15 = vrot.slane %v831_v37, 2 }
 0x11c   : > { %v731_v16 = vmax.f32 %v715_v11, 0.0  ;;  %v904_v17 = vsel %vm418_vm2, %v903_v6, %v902_v39  ;;  %v828_v18 = vrot.slane %v827_v12, 1  ;;  %v762_v20 = vrot.slane %v761_v47, 1 }
 0x11d   : > { %v821_v19 = vadd.f32 %v820_v14, %v819_v3  ;;  %v817_v21 = vadd.f32 %v816_v54, %v815_v9  ;;  %v833_v8 = vadd.f32 %v832_v15, %v831_v37  ;;  %v767_v10 = vadd.f32 %v766_v34, %v1563_v0 }
 0x11e   : > { %v776_v57 = vrot.slane %v730_v44, 4  ;;  %v829_v60 = vadd.f32 %v828_v18, %v827_v12  ;;  %v763_v23 = vadd.f32 %v762_v20, %v761_v47  ;;  %v782_v53 = vrot.slane %v731_v16, 4 }
 0x11f   : > { %v822_v22 = vrot.slane %v821_v19, 1  ;;  %v848_v41 = vsub.f32 %v817_v21, %v1620_v24  ;;  %v834_v25 = vrot.slane %v833_v8, 1  ;;  %v768_v26 = vrot.slane %v767_v10, 1 }
 0x120   : > { %v777_v13 = vadd.f32 %v776_v57, %v730_v44  ;;  %v847_v28 = vsub.f32 %v811_v1, %v1603_v52  ;;  %v906_v29 = vsel %vm421_vm3, %v905_v4, %v904_v17  ;;  %v783_v59 = vadd.f32 %v782_v53, %v731_v16 }
 0x121   : > { %v823_v31 = vadd.f32 %v822_v22, %v821_v19  ;;  %v850_v32 = vsub.f32 %v829_v60, %v1622_v27  ;;  %v769_v7 = vadd.f32 %v768_v26, %v767_v10  ;;  %v839_v34 = vsub.f32 %v763_v23, %v1540_v42 }
 0x122   : > { %v778_v0 = vrot.slane %v777_v13, 2  ;;  %v908_v33 = vrot.slane %v848_v41, 7  ;;  %v784_v43 = vrot.slane %v783_v59, 2  ;;  %v890_v24 = vsel %vm418_vm2, %v1609_v61, %v1595_v45 }
 0x123   : > { %v849_v5 = vsub.f32 %v823_v31, %v737_v40  ;;  %v835_v30 = vadd.f32 %v834_v25, %v833_v8  ;;  %v840_v52 = vsub.f32 %v769_v7, %v1535_v38  ;;  %v892_v55 = vsel %vm421_vm3, %v891_v51, %v890_v24 }
 0x124   : > { %v779_v46 = vadd.f32 %v778_v0, %v777_v13  ;;  %v785_v36 = vadd.f32 %v784_v43, %v783_v59  ;;  %v893_v27 = vsel %vm423_vm4, %v839_v34, %v892_v55  ;;  %v907_v58 = vsel %vm423_vm4, %v847_v28, %v906_v29 }
 0x125   : > { %v910_v56 = vrot.slane %v849_v5, 6  ;;  %v894_v62 = vrot.slane %v840_v52, 7  ;;  %v909_v63 = vsel %vm426_vm5, %v908_v33, %v907_v58  ;;  %v851_v39 = vsub.f32 %v835_v30, %v1630_v49 }
 0x126   : > { %v780_v42 = vrot.slane %v779_v46, 1  ;;  %v786_v40 = vrot.slane %v785_v36, 1  ;;  %v896_v51 = vrot.slane %v841_v35, 6  ;;  %v912_v1 = vrot.slane %v850_v32, 5 }
 0x127   : > { %v895_v61 = vsel %vm426_vm5, %v894_v62, %v893_v27  ;;  %v911_v38 = vsel %vm429_vm6, %v910_v56, %v909_v63  ;;  %v914_v49 = vrot.slane %v851_v39, 4 }
 0x128   : > { %v781_v45 = vadd.f32 %v780_v42, %v779_v46  ;;  %v787_v2 = vadd.f32 %v786_v40, %v785_v36  ;;  %v897_v9 = vsel %vm429_vm6, %v896_v51, %v895_v61  ;;  %v913_v37 = vsel %vm432_vm7, %v912_v1, %v911_v38 }
 0x129   : > { %v915_v47 = vsel %vm435_vm8, %v914_v49, %v913_v37 }
 0x12a   : > { %v842_v3 = vsub.f32 %v781_v45, %v730_v44  ;;  %v843_v6 = vsub.f32 %v787_v2, %v731_v16 }
 0x12c   : > { %v898_v11 = vrot.slane %v842_v3, 5  ;;  %v900_v12 = vrot.slane %v843_v6, 4 }
 0x12e   : > { %v899_v14 = vsel %vm432_vm7, %v898_v11, %v897_v9 }
 0x12f   : > { %v901_v48 = vsel %vm435_vm8, %v900_v12, %v899_v14 }
 0x130   : > { %1190 = vmatprep.mubr.f32.mxu0 %v901_v48 }
 0x131   : > { %1191 = vmatmul.mubr.f32.vlgmr.msra.gmra.mxu0 %v915_v47 }
 0x1f1   : > { %v1192_v35 = vpop.f32.mrf.mxu0 }
 0x1f2   : > { %v990_v44 = vadd.f32 %v1192_v35, %v1092_v50 }
 0x1f3   : > { %v984_v4 = vpop.f32.mrf.mxu0 }
 0x1f4   : > { %994 = vst [vmem:[%s191_s27 + $0x8] sm:$0xff] %v990_v44  ;;  %v985_v54 = vadd.f32 %v1092_v50, %v984_v4 }
 0x1f6   : > { %993 = vst [vmem:[%s191_s27] sm:$0xff] %v985_v54 }
 0x1f7   : > { %1254 = shalt.err (!%p1251_p3)
}
 0x1f8   : > { %s1255_s11 = scalar_lea.hbm %s1683_s6, 256  ;;  %s1259_s14 = scalar_lea.hbm %s1729_s4, 1024 }
 0x1f9   : > { %p1256_p4 = scmp.ne.s32.totalorder %s1683_s6, %s1255_s11  ;;  %p1260_p9 = scmp.lt.s32.totalorder %s1683_s6, %s1729_s4 }
 0x1fa   : > { %p1261_p10 = scmp.lt.s32.totalorder %s1259_s14, %s1255_s11 }
 0x1fb   : > { %p1257_p7 = pnand %p1256_p4, %p1372_p5 }
 0x1fc   : > { %p1262_p11 = por %p1261_p10, %p1260_p9 }
 0x1fd   : > { %p1258_p8 = pneg %p1257_p7 }
 0x1ff   : > { %p1263_p12 = pnand %p1262_p11, %p1258_p8 }
 0x201   : > { %1266 = shalt.err (!%p1263_p12)
}
 0x202   : > { %s1307_s23 = smov 128   ;;  %s1308_s27 = smov 8  }
 0x203   : > { %1193 = dma.vmem_to_hbm [thread:$0]  (%p1372_p5), %s1678_s28, 256, %s1683_s6, %s1685_s7, %s1307_s23, %s1307_s23, %s1308_s27  }
 0x204 PF: > { %p1199_p13 = scmp.ge.s32.totalorder %s1301_s18, 2  ;;  %s1024_s29 = sand.u32 1, %s1289_s15  }
 0x205   : > { %s1025_s30 = scalar_lea.sflag [#allocation3], %s1024_s29 }
 0x206   : > { %p1196_p0 = pnand %p1199_p13, %p1376_p6 }
 0x208   : > { %p1197_p1 = pneg %p1196_p0 }
 0x20a   : > { %1284 = dma.done.wait (%p1197_p1), %s1025_s30, 256  }
 0x20b   : > { %1286 = vsyncadd (%p1197_p1), %s1025_s30, 4294967040  ;;  %p14_p2 = scmp.ge.s32.totalorder %s1359_s21, 6   ;;  %s1732_s15 = smov %s1293_s16 }
 0x20c   : > { %s1733_s16 = smov %s1297_s17  ;;  %s1734_s17 = smov %s1370_s24 }
 0x20d   : > { %s1735_s18 = smov %s1359_s21  ;;  %16 = sbr.rel (!%p14_p2) target bundleno = 3 (0x3), region = 71 }
 0x212   :  { %1030 = vsyncpa [#allocation3], 1 }
 0x213   :  { %1032 = vsyncpa [#allocation3 + $0x1], 1 }

</bundles_post_ra>
